<compile_context>
chip_gen: v7x
topology: tpu7x:2x2x1
jax: 0.10.0
libtpu: 0.0.40
codegen_flags: <defaults>
</compile_context>

<pallas_src>
import functools

import jax
import jax.numpy as jnp
from jax.experimental import pallas as pl
from jax.experimental.pallas import tpu as pltpu

_LANES = 128
# Total bytes of input tiles resident per grid step (2 inputs x 2 buffers).
_PER_STEP_INPUT_BYTES = 16 * 1024 * 1024
_VMEM_LIMIT_BYTES = 32 * 1024 * 1024


def _round_up(x, m):
    return ((x + m - 1) // m) * m


def _sublane_multiple(dtype):
    # Sub-32-bit dtypes pack along sublanes: (8,128) f32, (16,128) bf16,
    # (32,128) int8/fp8.
    return 8 * max(1, 4 // jnp.dtype(dtype).itemsize)


def _dice_partial_kernel(p_ref, t_ref, inter_out, denom_out,
                         inter_acc, denom_acc, *,
                         row_tile, valid_rows_last, num_blocks, may_overrun):
    c = pl.program_id(0)            # core-split axis ("parallel")
    i = pl.program_id(1)            # streaming/reduction axis ("arbitrary")
    bpc = pl.num_programs(1)
    g = c * bpc + i                 # global block index

    @pl.when(i == 0)
    def _init():
        inter_acc[...] = jnp.zeros_like(inter_acc)
        denom_acc[...] = jnp.zeros_like(denom_acc)

    def accumulate(p, t):
        p = p.astype(jnp.float32)
        t = t.astype(jnp.float32)
        # Tile-aligned reshape (no (8,128) boundary crossed): the axis-0 sum
        # is plain vreg VPU adds; no per-step cross-sublane XLU reduce.
        p3 = p.reshape(row_tile // 8, 8, _LANES)
        t3 = t.reshape(row_tile // 8, 8, _LANES)
        inter_acc[...] += jnp.sum(p3 * t3, axis=0)
        denom_acc[...] += jnp.sum(p3 + t3, axis=0)

    ragged = valid_rows_last < row_tile   # static
    if ragged:
        # Hot path: full blocks, zero masking work.
        @pl.when(g < num_blocks - 1)
        def _full():
            accumulate(p_ref[...], t_ref[...])

        # Cold path: the single (possibly partial) last block.
        @pl.when(g == num_blocks - 1)
        def _tail():
            row_ids = jax.lax.broadcasted_iota(jnp.int32, (row_tile, _LANES), 0)
            keep = row_ids < valid_rows_last
            accumulate(jnp.where(keep, p_ref[...], 0),
                       jnp.where(keep, t_ref[...], 0))
        # g >= num_blocks (core-split overrun) accumulates nothing.
    elif may_overrun:
        @pl.when(g < num_blocks)
        def _full():
            accumulate(p_ref[...], t_ref[...])
    else:
        accumulate(p_ref[...], t_ref[...])

    @pl.when(i == bpc - 1)
    def _finalize():
        inter_out[0] = inter_acc[...]
        denom_out[0] = denom_acc[...]


def dice_loss(pred, target, smooth=1e-6, max_rows_per_block=None):
    assert pred.shape == target.shape
    # Free reshape; keep the native dtype (cast to f32 happens in-kernel).
    p = pred.reshape(-1)
    t = target.reshape(-1)

    n = p.size
    rem = n % _LANES
    if rem:
        # Rare: element count not lane-aligned.  Pad only the <=127-element
        # tail with zeros (zeros don't change any of the sums).
        pad = _LANES - rem
        p = jnp.pad(p, (0, pad))
        t = jnp.pad(t, (0, pad))

    rows = p.size // _LANES
    p2 = p.reshape(rows, _LANES)
    t2 = t.reshape(rows, _LANES)

    # Dtype-aware sublane multiple (8 / 16 / 32 rows for 4B / 2B / 1B dtypes).
    multiple = max(_sublane_multiple(p2.dtype), _sublane_multiple(t2.dtype))

    # Row tile from the per-step VMEM budget (double-buffered pair of inputs).
    bytes_per_row = _LANES * (jnp.dtype(p2.dtype).itemsize +
                              jnp.dtype(t2.dtype).itemsize)
    budget_rows = _PER_STEP_INPUT_BYTES // (2 * bytes_per_row)
    budget_rows = max(multiple, (budget_rows // multiple) * multiple)
    if max_rows_per_block is not None:
        forced = max(multiple, (max_rows_per_block // multiple) * multiple)
        budget_rows = min(budget_rows, forced)

    row_tile = min(budget_rows, _round_up(rows, multiple))
    blocks = pl.cdiv(rows, row_tile)
    valid_rows_last = rows - (blocks - 1) * row_tile

    # Two-way split so v7x can drive one DMA stream per TensorCore; on
    # single-TC chips the "parallel" axis simply serializes (negligible cost).
    num_cores = 2 if blocks >= 2 else 1
    bpc = pl.cdiv(blocks, num_cores)
    may_overrun = num_cores * bpc > blocks

    if may_overrun:
        def row_map(c, i):
            # Clamp so the overrun step never issues an out-of-bounds DMA;
            # the kernel skips its accumulation.
            return (jnp.minimum(c * bpc + i, blocks - 1), 0)
    else:
        def row_map(c, i):
            return (c * bpc + i, 0)

    kernel = functools.partial(
        _dice_partial_kernel,
        row_tile=int(row_tile),
        valid_rows_last=int(valid_rows_last),
        num_blocks=int(blocks),
        may_overrun=bool(may_overrun),
    )

    inter_parts, denom_parts = pl.pallas_call(
        kernel,
        out_shape=(
            jax.ShapeDtypeStruct((num_cores, 8, _LANES), jnp.float32),
            jax.ShapeDtypeStruct((num_cores, 8, _LANES), jnp.float32),
        ),
        grid_spec=pltpu.PrefetchScalarGridSpec(
            num_scalar_prefetch=0,
            grid=(num_cores, bpc),
            in_specs=[
                pl.BlockSpec((row_tile, _LANES), row_map),
                pl.BlockSpec((row_tile, _LANES), row_map),
            ],
            out_specs=[
                pl.BlockSpec((1, 8, _LANES), lambda c, i: (c, 0, 0)),
                pl.BlockSpec((1, 8, _LANES), lambda c, i: (c, 0, 0)),
            ],
            scratch_shapes=[
                pltpu.VMEM((8, _LANES), jnp.float32),   # intersection partials
                pltpu.VMEM((8, _LANES), jnp.float32),   # denominator partials
            ],
        ),
        compiler_params=pltpu.CompilerParams(
            dimension_semantics=("parallel", "arbitrary"),
            vmem_limit_bytes=_VMEM_LIMIT_BYTES,
        ),
    )(p2, t2)

    # Tiny epilogue: collapse per-core (8,128) partials and form the loss.
    inter = jnp.sum(inter_parts, dtype=jnp.float32)
    denom = jnp.sum(denom_parts, dtype=jnp.float32)
    smooth = jnp.float32(smooth)
    return 1.0 - (2.0 * inter + smooth) / (denom + smooth)


def _ref_dice(pred, target, smooth=1e-6):
    pf = pred.astype(jnp.float32)
    tf = target.astype(jnp.float32)
    inter = jnp.sum(pf * tf)
    denom = jnp.sum(pf) + jnp.sum(tf)
    return 1.0 - (2.0 * inter + smooth) / (denom + smooth)


if __name__ == "__main__":
    key = jax.random.PRNGKey(0)
    kp, kt, kp2, kt2, kp3, kt3, kp4, kt4 = jax.random.split(key, 8)

    # 1) NCHW inputs, lane-aligned element count (single full block).
    pred = jax.nn.sigmoid(jax.random.normal(kp, (2, 4, 16, 16), dtype=jnp.float32))
    target = (jax.random.uniform(kt, (2, 4, 16, 16)) > 0.5).astype(jnp.float32)
    loss = dice_loss(pred, target)
    jax.block_until_ready(loss)
    ref = _ref_dice(pred, target)
    assert jnp.allclose(loss, ref, rtol=1e-5, atol=1e-6), (loss, ref)

    # 2) Ragged shape: lane-tail zero pad + in-kernel ragged-row masking.
    pred2 = jax.nn.sigmoid(jax.random.normal(kp2, (3, 5, 17, 19), dtype=jnp.float32))
    target2 = (jax.random.uniform(kt2, (3, 5, 17, 19)) > 0.5).astype(jnp.float32)
    loss2 = dice_loss(pred2, target2)
    jax.block_until_ready(loss2)
    ref2 = _ref_dice(pred2, target2)
    assert jnp.allclose(loss2, ref2, rtol=1e-5, atol=1e-6), (loss2, ref2)

    # 3) Forced small tile: multi-block stream + 2-way core split + overrun
    #    block + ragged last block, all in one.
    pred3 = jax.nn.sigmoid(jax.random.normal(kp3, (2, 3, 40, 40), dtype=jnp.float32))
    target3 = (jax.random.uniform(kt3, (2, 3, 40, 40)) > 0.5).astype(jnp.float32)
    loss3 = dice_loss(pred3, target3, max_rows_per_block=16)
    jax.block_until_ready(loss3)
    ref3 = _ref_dice(pred3, target3)
    assert jnp.allclose(loss3, ref3, rtol=1e-5, atol=1e-6), (loss3, ref3)

    # 4) bf16 inputs: dtype-aware sublane rounding, halves HBM traffic.
    pred4 = jax.nn.sigmoid(
        jax.random.normal(kp4, (2, 4, 32, 16), dtype=jnp.float32)).astype(jnp.bfloat16)
    target4 = (jax.random.uniform(kt4, (2, 4, 32, 16)) > 0.5).astype(jnp.bfloat16)
    loss4 = dice_loss(pred4, target4)
    jax.block_until_ready(loss4)
    ref4 = _ref_dice(pred4, target4)
    assert jnp.allclose(loss4, ref4, rtol=1e-4, atol=1e-5), (loss4, ref4)

    print("KERNEL_OK")
</pallas_src>

<mosaic_0001>
module attributes {stable_mosaic.version = 11 : i64} {
  func.func @_dice_partial_kernel(%arg0: i32, %arg1: i32, %arg2: memref<16x128xf32, #tpu.memory_space<vmem>>, %arg3: memref<16x128xf32, #tpu.memory_space<vmem>>, %arg4: memref<1x8x128xf32, #tpu.memory_space<vmem>>, %arg5: memref<1x8x128xf32, #tpu.memory_space<vmem>>, %arg6: memref<8x128xf32, #tpu.memory_space<vmem>>, %arg7: memref<8x128xf32, #tpu.memory_space<vmem>>) attributes {dimension_semantics = [#tpu.dimension_semantics<parallel>, #tpu.dimension_semantics<arbitrary>], iteration_bounds = array<i64: 1, 1>, scalar_prefetch = 0 : i64, scratch_operands = 2 : i64, tpu.core_type = #tpu.core_type<tc>, window_params = [{transform_indices = @transform_0, window_bounds = array<i64: 16, 128>}, {transform_indices = @transform_1, window_bounds = array<i64: 16, 128>}, {transform_indices = @transform_2, window_bounds = array<i64: 1, 8, 128>}, {transform_indices = @transform_3, window_bounds = array<i64: 1, 8, 128>}]} {
    %c0_i32 = arith.constant 0 : i32
    %0 = arith.cmpi eq, %arg1, %c0_i32 : i32
    %1 = arith.extui %0 : i1 to i32
    %c0_i32_0 = arith.constant 0 : i32
    %2 = arith.cmpi ne, %1, %c0_i32_0 : i32
    scf.if %2 {
      %cst_15 = arith.constant 0.000000e+00 : f32
      %20 = vector.broadcast %cst_15 : f32 to vector<8x128xf32>
      %c0_16 = arith.constant 0 : index
      %c0_17 = arith.constant 0 : index
      %21 = vector.load %arg6[%c0_16, %c0_17] : memref<8x128xf32, #tpu.memory_space<vmem>>, vector<8x128xf32>
      tpu.vector_store %arg6[%c0_16, %c0_17], %20 {strides = array<i32>} : memref<8x128xf32, #tpu.memory_space<vmem>>, vector<8x128xf32>,
      %cst_18 = arith.constant 0.000000e+00 : f32
      %22 = vector.broadcast %cst_18 : f32 to vector<8x128xf32>
      %c0_19 = arith.constant 0 : index
      %c0_20 = arith.constant 0 : index
      %23 = vector.load %arg7[%c0_19, %c0_20] : memref<8x128xf32, #tpu.memory_space<vmem>>, vector<8x128xf32>
      tpu.vector_store %arg7[%c0_19, %c0_20], %22 {strides = array<i32>} : memref<8x128xf32, #tpu.memory_space<vmem>>, vector<8x128xf32>,
    } else {
    }
    %c0 = arith.constant 0 : index
    %c0_1 = arith.constant 0 : index
    %3 = vector.load %arg2[%c0, %c0_1] : memref<16x128xf32, #tpu.memory_space<vmem>>, vector<16x128xf32>
    %c0_2 = arith.constant 0 : index
    %c0_3 = arith.constant 0 : index
    %4 = vector.load %arg3[%c0_2, %c0_3] : memref<16x128xf32, #tpu.memory_space<vmem>>, vector<16x128xf32>
    %5 = vector.shape_cast %3 : vector<16x128xf32> to vector<2x8x128xf32>
    %6 = vector.shape_cast %4 : vector<16x128xf32> to vector<2x8x128xf32>
    %c0_4 = arith.constant 0 : index
    %c0_5 = arith.constant 0 : index
    %7 = vector.load %arg6[%c0_4, %c0_5] : memref<8x128xf32, #tpu.memory_space<vmem>>, vector<8x128xf32>
    %8 = arith.mulf %5, %6 : vector<2x8x128xf32>
    %cst = arith.constant dense<0.000000e+00> : vector<8x128xf32>
    %9 = vector.multi_reduction <add>, %8, %cst [0] : vector<2x8x128xf32> to vector<8x128xf32>
    %10 = arith.addf %7, %9 : vector<8x128xf32>
    %c0_6 = arith.constant 0 : index
    %c0_7 = arith.constant 0 : index
    %11 = vector.load %arg6[%c0_6, %c0_7] : memref<8x128xf32, #tpu.memory_space<vmem>>, vector<8x128xf32>
    tpu.vector_store %arg6[%c0_6, %c0_7], %10 {strides = array<i32>} : memref<8x128xf32, #tpu.memory_space<vmem>>, vector<8x128xf32>,
    %c0_8 = arith.constant 0 : index
    %c0_9 = arith.constant 0 : index
    %12 = vector.load %arg7[%c0_8, %c0_9] : memref<8x128xf32, #tpu.memory_space<vmem>>, vector<8x128xf32>
    %13 = arith.addf %5, %6 : vector<2x8x128xf32>
    %cst_10 = arith.constant dense<0.000000e+00> : vector<8x128xf32>
    %14 = vector.multi_reduction <add>, %13, %cst_10 [0] : vector<2x8x128xf32> to vector<8x128xf32>
    %15 = arith.addf %12, %14 : vector<8x128xf32>
    %c0_11 = arith.constant 0 : index
    %c0_12 = arith.constant 0 : index
    %16 = vector.load %arg7[%c0_11, %c0_12] : memref<8x128xf32, #tpu.memory_space<vmem>>, vector<8x128xf32>
    tpu.vector_store %arg7[%c0_11, %c0_12], %15 {strides = array<i32>} : memref<8x128xf32, #tpu.memory_space<vmem>>, vector<8x128xf32>,
    %c0_i32_13 = arith.constant 0 : i32
    %17 = arith.cmpi eq, %arg1, %c0_i32_13 : i32
    %18 = arith.extui %17 : i1 to i32
    %c0_i32_14 = arith.constant 0 : i32
    %19 = arith.cmpi ne, %18, %c0_i32_14 : i32
    scf.if %19 {
      %c0_15 = arith.constant 0 : index
      %c0_16 = arith.constant 0 : index
      %20 = vector.load %arg6[%c0_15, %c0_16] : memref<8x128xf32, #tpu.memory_space<vmem>>, vector<8x128xf32>
      %c0_17 = arith.constant 0 : index
      %c0_18 = arith.constant 0 : index
      %c0_19 = arith.constant 0 : index
      %21 = vector.load %arg4[%c0_17, %c0_18, %c0_19] : memref<1x8x128xf32, #tpu.memory_space<vmem>>, vector<1x8x128xf32>
      %22 = vector.shape_cast %21 : vector<1x8x128xf32> to vector<8x128xf32>
      %23 = vector.shape_cast %20 : vector<8x128xf32> to vector<1x8x128xf32>
      tpu.vector_store %arg4[%c0_17, %c0_18, %c0_19], %23 {strides = array<i32>} : memref<1x8x128xf32, #tpu.memory_space<vmem>>, vector<1x8x128xf32>,
      %c0_20 = arith.constant 0 : index
      %c0_21 = arith.constant 0 : index
      %24 = vector.load %arg7[%c0_20, %c0_21] : memref<8x128xf32, #tpu.memory_space<vmem>>, vector<8x128xf32>
      %c0_22 = arith.constant 0 : index
      %c0_23 = arith.constant 0 : index
      %c0_24 = arith.constant 0 : index
      %25 = vector.load %arg5[%c0_22, %c0_23, %c0_24] : memref<1x8x128xf32, #tpu.memory_space<vmem>>, vector<1x8x128xf32>
      %26 = vector.shape_cast %25 : vector<1x8x128xf32> to vector<8x128xf32>
      %27 = vector.shape_cast %24 : vector<8x128xf32> to vector<1x8x128xf32>
      tpu.vector_store %arg5[%c0_22, %c0_23, %c0_24], %27 {strides = array<i32>} : memref<1x8x128xf32, #tpu.memory_space<vmem>>, vector<1x8x128xf32>,
    } else {
    }
    return
  }
  func.func @transform_0(%arg0: i32, %arg1: i32) -> (i32, i32) {
    %c1_i32 = arith.constant 1 : i32
    %0 = arith.muli %arg0, %c1_i32 : i32
    %1 = arith.addi %0, %arg1 : i32
    %c0_i32 = arith.constant 0 : i32
    %c0_i32_0 = arith.constant 0 : i32
    return %1, %c0_i32 : i32, i32
  }
  func.func @transform_1(%arg0: i32, %arg1: i32) -> (i32, i32) {
    %c1_i32 = arith.constant 1 : i32
    %0 = arith.muli %arg0, %c1_i32 : i32
    %1 = arith.addi %0, %arg1 : i32
    %c0_i32 = arith.constant 0 : i32
    %c0_i32_0 = arith.constant 0 : i32
    return %1, %c0_i32 : i32, i32
  }
  func.func @transform_2(%arg0: i32, %arg1: i32) -> (i32, i32, i32) {
    %c0_i32 = arith.constant 0 : i32
    %c0_i32_0 = arith.constant 0 : i32
    %c0_i32_1 = arith.constant 0 : i32
    return %arg0, %c0_i32, %c0_i32_0 : i32, i32, i32
  }
  func.func @transform_3(%arg0: i32, %arg1: i32) -> (i32, i32, i32) {
    %c0_i32 = arith.constant 0 : i32
    %c0_i32_0 = arith.constant 0 : i32
    %c0_i32_1 = arith.constant 0 : i32
    return %arg0, %c0_i32, %c0_i32_0 : i32, i32, i32
  }
}

</mosaic_0001>

<bundles_post_ra>
// kernel: tpu_custom_call.1
= control target key start
LH: loop header
LB: loop body
LE: loop exit
PB: predicated region body
PF: predicated region fallthrough
CT: control target
= control target key end

     0   :  { %9 = vsyncpa [#allocation5], 0  ;;  %s290_s0 = inlined_call_operand.hbm [shape: f32[16,128], index: 0, kind: input, shape index: {}]   ;;  %s291_s1 = inlined_call_operand.hbm [shape: f32[16,128], index: 1, kind: input, shape index: {}]   ;;  %s292_s2 = inlined_call_operand.hbm [shape: f32[1,8,128], index: 2, kind: output, shape index: {0}]   ;;  %s293_s3 = inlined_call_operand.hbm [shape: f32[1,8,128], index: 3, kind: output, shape index: {1}]  }
   0x1   :  { %10 = vsyncpa [#allocation8], 0 }
   0x2   :  { %11 = vsyncpa [#allocation6], 0 }
   0x3   :  { %12 = vsyncpa [#allocation11], 0  ;;  %s216_s12 = smov [#allocation4]   ;;  %s120_s16 = scalar_lea.hbm %s290_s0, 256 }
   0x4   :  { %s22_s13 = sshll.u32 %s216_s12, 4  ;;  %p121_p0 = scmp.ne.s32.totalorder %s290_s0, %s120_s16  ;;  %s23_s13 = int_to_ptr.vmem [resolvable:$true] %s22_s13 }
   0x5   :  { %p124_p1 = scmp.lt.u32.totalorder %s120_s16, %s290_s0 }
   0x7   :  { %p126_p2 = pnand %p124_p1, %p121_p0 }
   0x9   :  { %129 = shalt.err (!%p126_p2)
}
   0xa   :  { %s130_s21 = scalar_lea.vmem %s23_s13, 256  ;;  %p135_p4 = scmp.lt.s32.totalorder %s23_s13, %s23_s13 }
   0xb   :  { %p131_p3 = scmp.ne.s32.totalorder %s23_s13, %s130_s21  ;;  %p136_p5 = scmp.lt.s32.totalorder %s130_s21, %s130_s21 }
   0xd   :  { %p137_p6 = por %p136_p5, %p135_p4 }
   0xf   :  { %p138_p7 = pnand %p137_p6, %p131_p3 }
  0x11   :  { %141 = shalt.err (!%p138_p7)
}
  0x12   :  { %s217_s22 = smov 128   ;;  %s218_s23 = smov 8  }
  0x13   :  { %28 = dma.hbm_to_vmem [thread:$0]  %s290_s0, 256, %s23_s13, [#allocation5], %s217_s22, %s217_s22, %s218_s23  }
  0x14   :  { %s219_s26 = smov [#allocation7]   ;;  %s142_s30 = scalar_lea.hbm %s291_s1, 256 }
  0x15   :  { %s38_s27 = sshll.u32 %s219_s26, 4  ;;  %p143_p8 = scmp.ne.s32.totalorder %s291_s1, %s142_s30  ;;  %s39_s27 = int_to_ptr.vmem [resolvable:$true] %s38_s27 }
  0x16   :  { %p146_p9 = scmp.lt.u32.totalorder %s142_s30, %s291_s1 }
  0x18   :  { %p148_p10 = pnand %p146_p9, %p143_p8 }
  0x1a   :  { %151 = shalt.err (!%p148_p10)
}
  0x1b   :  { %s152_s8 = scalar_lea.vmem %s39_s27, 256  ;;  %p157_p12 = scmp.lt.s32.totalorder %s39_s27, %s39_s27 }
  0x1c   :  { %p153_p11 = scmp.ne.s32.totalorder %s39_s27, %s152_s8  ;;  %p158_p13 = scmp.lt.s32.totalorder %s152_s8, %s152_s8 }
  0x1e   :  { %p159_p0 = por %p158_p13, %p157_p12 }
  0x20   :  { %p160_p1 = pnand %p159_p0, %p153_p11 }
  0x22   :  { %163 = shalt.err (!%p160_p1)
}
  0x23   :  { %44 = dma.hbm_to_vmem [thread:$0]  %s291_s1, 256, %s39_s27, [#allocation8], %s217_s22, %s217_s22, %s218_s23  }
  0x24   :  { %208 = dma.done.wait [#allocation5], 256  }
  0x25   :  { %209 = vsyncadd [#allocation5], 4294967040 }
  0x26   :  { %210 = dma.done.wait [#allocation8], 256  }
  0x27   :  { %211 = vsyncadd [#allocation8], 4294967040  ;;  %v61_v0 = vld [vmem:[#allocation4] sm:$0xff]  ;;  %v62_v1 = vld [vmem:[#allocation4 + $0x8] sm:$0xff]  ;;  %s220_s10 = smov [#allocation9]   ;;  %s221_s12 = smov [#allocation10]  }
  0x28   :  { %v63_v2 = vld [vmem:[#allocation7] sm:$0xff]  ;;  %v64_v3 = vld [vmem:[#allocation7 + $0x8] sm:$0xff]  ;;  %s90_s11 = sshll.u32 %s220_s10, 4  ;;  %s100_s13 = sshll.u32 %s221_s12, 4  ;;  %s91_s11 = int_to_ptr.vmem [resolvable:$true] %s90_s11  ;;  %s101_s13 = int_to_ptr.vmem [resolvable:$true] %s100_s13 }
  0x29   :  { %v66_v4 = vmul.f32 %v63_v2, %v61_v0  ;;  %v72_v5 = vadd.f32 %v63_v2, %v61_v0  ;;  %v67_v6 = vmul.f32 %v64_v3, %v62_v1  ;;  %v73_v7 = vadd.f32 %v64_v3, %v62_v1  ;;  %s164_s1 = scalar_lea.vmem %s91_s11, 128  ;;  %p169_p3 = scmp.lt.s32.totalorder %s91_s11, %s91_s11 }
  0x2a   :  { %p165_p2 = scmp.ne.s32.totalorder %s91_s11, %s164_s1  ;;  %p170_p4 = scmp.lt.s32.totalorder %s164_s1, %s164_s1 }
  0x2b   :  { %v68_v8 = vadd.f32 %v67_v6, %v66_v4  ;;  %v74_v9 = vadd.f32 %v73_v7, %v72_v5 }
  0x2c   :  { %p171_p5 = por %p170_p4, %p169_p3 }
  0x2d   :  { %81 = vst [vmem:[#allocation9] sm:$0xff] %v68_v8  ;;  %83 = vst [vmem:[#allocation10] sm:$0xff] %v74_v9 }
  0x2e   :  { %p172_p6 = pnand %p171_p5, %p165_p2 }
  0x30   :  { %175 = shalt.err (!%p172_p6)
}
  0x31   :  { %s176_s16 = scalar_lea.hbm %s292_s2, 128 }
  0x32   :  { %p177_p7 = scmp.ne.s32.totalorder %s292_s2, %s176_s16  ;;  %p180_p8 = scmp.lt.u32.totalorder %s176_s16, %s292_s2 }
  0x34   :  { %p182_p9 = pnand %p180_p8, %p177_p7 }
  0x36   :  { %185 = shalt.err (!%p182_p9)
}
  0x37   :  { %93 = dma.vmem_to_hbm [thread:$0]  %s91_s11, 128, %s292_s2, [#allocation6]  }
  0x38   :  { %s186_s23 = scalar_lea.vmem %s101_s13, 128  ;;  %p191_p11 = scmp.lt.s32.totalorder %s101_s13, %s101_s13 }
  0x39   :  { %p187_p10 = scmp.ne.s32.totalorder %s101_s13, %s186_s23  ;;  %p192_p12 = scmp.lt.s32.totalorder %s186_s23, %s186_s23 }
  0x3b   :  { %p193_p13 = por %p192_p12, %p191_p11 }
  0x3d   :  { %p194_p0 = pnand %p193_p13, %p187_p10 }
  0x3f   :  { %197 = shalt.err (!%p194_p0)
}
  0x40   :  { %s198_s26 = scalar_lea.hbm %s293_s3, 128 }
  0x41   :  { %p199_p1 = scmp.ne.s32.totalorder %s293_s3, %s198_s26  ;;  %p202_p2 = scmp.lt.u32.totalorder %s198_s26, %s293_s3 }
  0x43   :  { %p204_p3 = pnand %p202_p2, %p199_p1 }
  0x45   :  { %207 = shalt.err (!%p204_p3)
}
  0x46   :  { %103 = dma.vmem_to_hbm [thread:$0]  %s101_s13, 128, %s293_s3, [#allocation11]  }
  0x47   :  { %212 = dma.done.wait [#allocation6], 128  }
  0x48   :  { %213 = vsyncadd [#allocation6], 4294967168 }
  0x49   :  { %214 = dma.done.wait [#allocation11], 128  }
  0x4a   :  { %215 = vsyncadd [#allocation11], 4294967168 }
  0x4b   :  { %110 = vsyncpa [#allocation5], 1 }
  0x4c   :  { %111 = vsyncpa [#allocation8], 1 }
  0x4d   :  { %112 = vsyncpa [#allocation6], 1 }
  0x4e   :  { %113 = vsyncpa [#allocation11], 1 }

</bundles_post_ra>
